<compile_context>
chip_gen: v5e
topology: v5e:2x2
jax: 0.10.0
libtpu: 0.0.40
codegen_flags: <defaults>
</compile_context>

<pallas_src>
import jax
import jax.numpy as jnp
from jax.experimental import pallas as pl
from jax.experimental.pallas import tpu as pltpu


def _make_kernel(classes: int, smoothing: float):
    confidence = 1.0 - smoothing
    off = smoothing / (classes - 1)
    extra = confidence - off

    def kernel(pred_ref, tgt_ref, out_ref):
        pred = pred_ref[...]                      # (TN, C), native dtype
        tgt = tgt_ref[...]                        # (TN, 1), int32
        tn, c = pred.shape

        # Cheap (TN, 1) reductions straight off the native-dtype tile.
        row_max = jnp.max(pred, axis=-1, keepdims=True)                   # native
        row_sum = jnp.sum(pred, axis=-1, keepdims=True, dtype=jnp.float32)

        # Target pick: masked row-reduction on RAW pred in native dtype
        # (exactly one non-zero per row -> exact even in bf16, no gather).
        class_ids = jax.lax.broadcasted_iota(jnp.int32, (tn, c), 1)
        pred_tgt = jnp.sum(jnp.where(class_ids == tgt, pred, 0),
                           axis=-1, keepdims=True, dtype=jnp.float32)

        # Single C-wide intermediate: exp(pred - row_max), native dtype on the
        # shift / exp input (argument <= 0, numerically safe in bf16);
        # the exp-sum accumulates in f32.
        e = jnp.exp(pred - row_max)
        lse = jnp.log(jnp.sum(e, axis=-1, keepdims=True, dtype=jnp.float32))

        row_max_f = row_max.astype(jnp.float32)
        # sum_j logp_j = sum_j pred_j - C*row_max - C*logsumexp
        sum_logp = row_sum - c * row_max_f - c * lse
        # logp[target] = pred[target] - row_max - logsumexp
        logp_tgt = pred_tgt - row_max_f - lse

        # sum_j true_dist_j * logp_j = off*sum(logp) + (conf - off)*logp[target]
        out_ref[...] = -(off * sum_logp + extra * logp_tgt)

    return kernel


def _vmem_budget_bytes():
    """Roughly half the physical VMEM of the current generation.
    v5e/v6e (128 MiB) -> 64 MiB, v7x (64 MiB) -> 32 MiB."""
    try:
        cap = int(pltpu.get_tpu_info().vmem_capacity_bytes)
    except Exception:
        cap = 128 * 1024 * 1024
    return max(16 * 1024 * 1024, min(cap // 2, 100 * 1024 * 1024))


def _pick_tile_n(n, c, in_itemsize, vmem_budget):
    """Rows per tile, sized by what actually sits in VMEM:
      2x double-buffered native-dtype input row
    + ~1x f32-sized exp intermediate row
    + 2x lane-padded (x128) int32 target + f32 per-row-loss blocks."""
    per_row = 2 * c * in_itemsize + 4 * c + 4 * 128 * 4
    rows = int(0.6 * vmem_budget) // max(1, per_row)   # headroom for compiler scratch
    # Keep >= ~8 grid blocks so both v7x TCs plus the double-buffered pipeline
    # always have work in flight (no-op for small N).
    rows = min(rows, -(-n // 8))
    return max(8, rows)


def label_smoothing_loss(pred, target, classes: int, smoothing: float = 0.0,
                         tile_n=None):
    """Pallas TPU LabelSmoothingLoss.forward -> scalar mean loss."""
    n, c = pred.shape
    assert c == classes
    assert classes > 1, "label smoothing requires classes > 1"

    itemsize = jnp.dtype(pred.dtype).itemsize
    vmem_budget = _vmem_budget_bytes()
    if tile_n is None:
        tile_n = _pick_tile_n(n, c, itemsize, vmem_budget)
    # Round rows to the dtype's sublane packing (8 for f32, 16 for bf16).
    min_rows = 8 * max(1, 4 // itemsize)
    tile_n = max(min_rows, (tile_n // min_rows) * min_rows)
    # No point tiling coarser than the sublane-padded batch itself.
    tile_n = min(tile_n, -(-n // min_rows) * min_rows)
    # TODO(synk): for vocabularies so large that a single (8, C) block overflows
    # VMEM, chunk C inside the kernel with a fori_loop + (TN,1) f32 accumulators.

    tgt2d = target.astype(jnp.int32).reshape(n, 1)
    num_blocks = pl.cdiv(n, tile_n)

    per_row = pl.pallas_call(
        _make_kernel(classes, smoothing),
        out_shape=jax.ShapeDtypeStruct((n, 1), jnp.float32),
        grid=(num_blocks,),
        in_specs=[
            pl.BlockSpec((tile_n, c), lambda i: (i, 0)),   # pred tile (native dtype)
            pl.BlockSpec((tile_n, 1), lambda i: (i, 0)),   # target tile
        ],
        # Per-row loss; rows beyond N in the last partial block are dropped on
        # masked writeback, so no in-kernel masking / count tracking needed.
        out_specs=pl.BlockSpec((tile_n, 1), lambda i: (i, 0)),
        compiler_params=pltpu.CompilerParams(
            dimension_semantics=("parallel",),
            vmem_limit_bytes=vmem_budget,
        ),
    )(pred, tgt2d)

    # Final mean over the true batch size (partial reductions -> wrapper).
    return jnp.mean(per_row[:, 0])


def _reference(pred, target, classes, smoothing):
    # pure-JAX reference mirroring the PyTorch forward
    confidence = 1.0 - smoothing
    logp = jax.nn.log_softmax(pred.astype(jnp.float32), axis=-1)
    true_dist = jnp.full_like(logp, smoothing / (classes - 1))
    true_dist = true_dist.at[jnp.arange(pred.shape[0]), target].set(confidence)
    return jnp.mean(jnp.sum(-true_dist * logp, axis=-1))


if __name__ == "__main__":
    smoothing = 0.1
    key = jax.random.PRNGKey(0)

    # --- small shape, explicit tiny tile -> exercises grid + partial block ---
    N, C = 10, 32
    k_pred, k_tgt = jax.random.split(key)
    pred = jax.random.normal(k_pred, (N, C), dtype=jnp.float32)
    target = jax.random.randint(k_tgt, (N,), 0, C, dtype=jnp.int32)

    loss = label_smoothing_loss(pred, target, classes=C, smoothing=smoothing, tile_n=8)
    loss = jax.block_until_ready(loss)
    ref = _reference(pred, target, C, smoothing)
    assert jnp.allclose(loss, ref, rtol=1e-5, atol=1e-5), (loss, ref)

    # bf16 path: DMA stays bf16, elementwise math stays bf16, f32 accumulation
    pred_bf16 = pred.astype(jnp.bfloat16)
    loss_bf16 = jax.block_until_ready(
        label_smoothing_loss(pred_bf16, target, classes=C, smoothing=smoothing))
    ref_bf16 = _reference(pred_bf16.astype(jnp.float32), target, C, smoothing)
    assert jnp.allclose(loss_bf16, ref_bf16, rtol=5e-3, atol=5e-3), (loss_bf16, ref_bf16)

    # --- default (VMEM-budget) tiling, multi-block grid with partial tail ---
    N2, C2 = 300, 128
    k_pred2, k_tgt2 = jax.random.split(jax.random.PRNGKey(1))
    pred2 = jax.random.normal(k_pred2, (N2, C2), dtype=jnp.float32)
    target2 = jax.random.randint(k_tgt2, (N2,), 0, C2, dtype=jnp.int32)
    loss2 = jax.block_until_ready(
        label_smoothing_loss(pred2, target2, classes=C2, smoothing=smoothing))
    ref2 = _reference(pred2, target2, C2, smoothing)
    assert jnp.allclose(loss2, ref2, rtol=1e-5, atol=1e-5), (loss2, ref2)

    print("KERNEL_OK")
</pallas_src>

<mosaic_0001>
module attributes {stable_mosaic.version = 11 : i64} {
  func.func @kernel(%arg0: i32, %arg1: memref<8x32xf32, #tpu.memory_space<vmem>>, %arg2: memref<8x1xi32, #tpu.memory_space<vmem>>, %arg3: memref<8x1xf32, #tpu.memory_space<vmem>>) attributes {dimension_semantics = [#tpu.dimension_semantics<parallel>], iteration_bounds = array<i64: 2>, scalar_prefetch = 0 : i64, scratch_operands = 0 : i64, tpu.core_type = #tpu.core_type<tc>, window_params = [{transform_indices = @transform_0, window_bounds = array<i64: 8, 32>}, {transform_indices = @transform_1, window_bounds = array<i64: 8, 1>}, {transform_indices = @transform_2, window_bounds = array<i64: 8, 1>}]} {
    %c0 = arith.constant 0 : index
    %c0_0 = arith.constant 0 : index
    %0 = vector.load %arg1[%c0, %c0_0] : memref<8x32xf32, #tpu.memory_space<vmem>>, vector<8x32xf32>
    %c0_1 = arith.constant 0 : index
    %c0_2 = arith.constant 0 : index
    %1 = vector.load %arg2[%c0_1, %c0_2] : memref<8x1xi32, #tpu.memory_space<vmem>>, vector<8x1xi32>
    %cst = arith.constant dense<0xFF800000> : vector<8xf32>
    %2 = vector.multi_reduction <maximumf>, %0, %cst [1] : vector<8x32xf32> to vector<8xf32>
    %3 = vector.shape_cast %2 : vector<8xf32> to vector<8x1xf32>
    %cst_3 = arith.constant dense<0.000000e+00> : vector<8xf32>
    %4 = vector.multi_reduction <add>, %0, %cst_3 [1] : vector<8x32xf32> to vector<8xf32>
    %5 = vector.shape_cast %4 : vector<8xf32> to vector<8x1xf32>
    %6 = tpu.iota {dimensions = array<i32: 1>} : vector<8x32xi32>
    %7 = vector.broadcast %1 : vector<8x1xi32> to vector<8x32xi32>
    %8 = arith.cmpi eq, %6, %7 : vector<8x32xi32>
    %c0_i32 = arith.constant 0 : i32
    %9 = arith.sitofp %c0_i32 : i32 to f32
    %10 = vector.broadcast %9 : f32 to vector<8x32xf32>
    %11 = arith.select %8, %0, %10 : vector<8x32xi1>, vector<8x32xf32>
    %cst_4 = arith.constant dense<0.000000e+00> : vector<8xf32>
    %12 = vector.multi_reduction <add>, %11, %cst_4 [1] : vector<8x32xf32> to vector<8xf32>
    %13 = vector.shape_cast %12 : vector<8xf32> to vector<8x1xf32>
    %14 = vector.broadcast %3 : vector<8x1xf32> to vector<8x32xf32>
    %15 = arith.subf %0, %14 : vector<8x32xf32>
    %16 = math.exp %15 : vector<8x32xf32>
    %cst_5 = arith.constant dense<0.000000e+00> : vector<8xf32>
    %17 = vector.multi_reduction <add>, %16, %cst_5 [1] : vector<8x32xf32> to vector<8xf32>
    %18 = vector.shape_cast %17 : vector<8xf32> to vector<8x1xf32>
    %19 = math.log %18 : vector<8x1xf32>
    %cst_6 = arith.constant 3.200000e+01 : f32
    %20 = vector.broadcast %cst_6 : f32 to vector<8x1xf32>
    %21 = arith.mulf %20, %3 : vector<8x1xf32>
    %22 = arith.subf %5, %21 : vector<8x1xf32>
    %cst_7 = arith.constant 3.200000e+01 : f32
    %23 = vector.broadcast %cst_7 : f32 to vector<8x1xf32>
    %24 = arith.mulf %23, %19 : vector<8x1xf32>
    %25 = arith.subf %22, %24 : vector<8x1xf32>
    %26 = arith.subf %13, %3 : vector<8x1xf32>
    %27 = arith.subf %26, %19 : vector<8x1xf32>
    %cst_8 = arith.constant 0.0032258064 : f32
    %28 = vector.broadcast %cst_8 : f32 to vector<8x1xf32>
    %29 = arith.mulf %28, %25 : vector<8x1xf32>
    %cst_9 = arith.constant 0.896774172 : f32
    %30 = vector.broadcast %cst_9 : f32 to vector<8x1xf32>
    %31 = arith.mulf %30, %27 : vector<8x1xf32>
    %32 = arith.addf %29, %31 : vector<8x1xf32>
    %cst_10 = arith.constant 0.000000e+00 : f32
    %33 = vector.broadcast %cst_10 : f32 to vector<8x1xf32>
    %34 = arith.subf %33, %32 : vector<8x1xf32>
    %c0_11 = arith.constant 0 : index
    %c0_12 = arith.constant 0 : index
    %35 = vector.load %arg3[%c0_11, %c0_12] : memref<8x1xf32, #tpu.memory_space<vmem>>, vector<8x1xf32>
    tpu.vector_store %arg3[%c0_11, %c0_12], %34 {strides = array<i32>} : memref<8x1xf32, #tpu.memory_space<vmem>>, vector<8x1xf32>,
    return
  }
  func.func @transform_0(%arg0: i32) -> (i32, i32) {
    %c0_i32 = arith.constant 0 : i32
    %c0_i32_0 = arith.constant 0 : i32
    return %arg0, %c0_i32 : i32, i32
  }
  func.func @transform_1(%arg0: i32) -> (i32, i32) {
    %c0_i32 = arith.constant 0 : i32
    %c0_i32_0 = arith.constant 0 : i32
    return %arg0, %c0_i32 : i32, i32
  }
  func.func @transform_2(%arg0: i32) -> (i32, i32) {
    %c0_i32 = arith.constant 0 : i32
    %c0_i32_0 = arith.constant 0 : i32
    return %arg0, %c0_i32 : i32, i32
  }
}

</mosaic_0001>

<bundles_post_ra>
// kernel: tpu_custom_call.1
= control target key start
LH: loop header
LB: loop body
LE: loop exit
PB: predicated region body
PF: predicated region fallthrough
CT: control target
= control target key end

     0   :  { %s308_s9 = smov 0   ;;  %s337_s0 = inlined_call_operand.vmem [shape: f32[10,32], index: 0, kind: input, shape index: {}]   ;;  %s338_s1 = inlined_call_operand.vmem [shape: s32[10,1], index: 1, kind: input, shape index: {}]   ;;  %s339_s2 = inlined_call_operand.vmem [shape: f32[10,1], index: 2, kind: output, shape index: {}]  }
   0x1 LB: > { %s260_s10 = sadd.s32 4294967295, %s290_s9   ;;  %p264_p0 = scmp.ge.s32.totalorder %s290_s9, 1  ;;  %s290_s9 = sphi %s308_s9, %s12_s9  }
   0x2   : > { %p120_p1 = scmp.lt.s32.totalorder %s290_s9, 3 }
   0x4   : > { %p121_p2 = pnand %p264_p0, %p120_p1 }
   0x5   : > { %p144_p3 = scmp.lt.s32.totalorder (!%p121_p2), %s260_s10, 1 }
   0x6   : > { %124 = sbr.rel (%p121_p2) target bundleno = 281 (0x119), region = 28 }
   0xb   : > { %v292_v0 = vmov 0   ;;  %s341_s10 = smov (!%p144_p3, %s260_s10), 1  ;;  %vm158_vm0 = vcmask 261120   ;;  %v165_v9 = vlaneseq  ;;  %vm193_vm2 = vcmask 7168  }
   0xc   : > { %279 = vset.pattern.permute.xlu0 %v292_v0  ;;  %s316_s11 = sshll.u32 %s341_s10, 3 }
   0xd   : > { %s147_s14 = scalar_lea.vmem %s337_s0, %s316_s11  ;;  %s151_s17 = scalar_lea.vmem %s338_s1, %s316_s11  ;;  %v166_v10 = vand.u32 127, %v165_v9 }
   0xe   : > { %v156_v1 = vld [vmem:[%s147_s14] sm:$0xff]  ;;  %s155_s20 = scalar_lea.vmem %s339_s2, %s316_s11 }
   0xf   : > { %v159_v2 = vsel %vm158_vm0, %v156_v1, -inf  ;;  %v157_v3 = vld [vmem:[%s151_s17] sm:$0xff]  ;;  %v162_v11 = vsel %vm158_vm0, %v156_v1, 0.0 }
  0x10   : > { %160 = vmax.xlane.f32.xlu0 %v159_v2 }
  0x24   : > { %168 = vperm.xlu0 %279, %v157_v3  }
  0x83   : > { %v161_v4 = vpop.xlane.xlu0 %160 }
  0x84   : > { %v175_v5 = vsub.f32 %v156_v1, %v161_v4  ;;  %v183_v17 = vmul.f32 32.0, %v161_v4 }
  0x86   : > { %v176_v6 = vmul.f32 1.442695, %v175_v5 }
  0x88   : > { %280 = vpow2.f32 %v176_v6 }
  0x8e   : > { %v281_v7 = vpop.eup %280 }
  0x8f   : > { %v178_v8 = vsel %vm158_vm0, %v281_v7, 0.0 }
  0x90   : > { %179 = vadd.xlane.f32.xlu1 %v178_v8 }
  0x96   : > { %v169_v12 = vpop.permute.xlu0 %168 }
  0x97   : > { %vm170_vm1 = vcmp.eq.s32.totalorder %v166_v10, %v169_v12 }
  0x98   : > { %163 = vadd.xlane.f32.xlu1 %v162_v11  ;;  %v171_v13 = vsel %vm170_vm1, %v156_v1, 0.0 }
  0x99   : > { %v172_v14 = vsel %vm158_vm0, %v171_v13, 0.0 }
  0x9a   : > { %173 = vadd.xlane.f32.xlu2 %v172_v14 }
 0x103   : > { %v180_v15 = vpop.xlane.xlu1 %179 }
 0x104   : > { %282 = vlog2.f32 %v180_v15 }
 0x10a   : > { %v283_v16 = vpop.eup %282 }
 0x10b   : > { %v182_v18 = vmul.f32 0.6931472, %v283_v16  ;;  %v164_v19 = vpop.xlane.xlu1 %163 }
 0x10c   : > { %v184_v20 = vsub.f32 %v164_v19, %v183_v17 }
 0x10d   : > { %v185_v21 = vmul.f32 32.0, %v182_v18  ;;  %v174_v22 = vpop.xlane.xlu2 %173 }
 0x10e   : > { %v187_v23 = vsub.f32 %v174_v22, %v161_v4 }
 0x10f   : > { %v186_v24 = vsub.f32 %v184_v20, %v185_v21 }
 0x110   : > { %v188_v25 = vsub.f32 %v187_v23, %v182_v18 }
 0x111   : > { %v189_v26 = vmul.f32 0.0032258064, %v186_v24 }
 0x112   : > { %v190_v27 = vmul.f32 0.8967742, %v188_v25 }
 0x114   : > { %v191_v28 = vadd.f32 %v190_v27, %v189_v26 }
 0x116   : > { %v192_v29 = vsub.f32 0.0, %v191_v28 }
 0x118   : > { %194 = vst.msk [vmem:[%s155_s20] sm:$0xff] %vm193_vm2, %v192_v29 }
 0x119 PF: > { %s12_s9 = sadd.s32 1, %s290_s9  }
 0x11a   : > { %p9_p4 = scmp.ge.s32.totalorder %s12_s9, 4  }
 0x11c   :  { %11 = sbr.rel (!%p9_p4) target bundleno = 1 (0x1), region = 61 }

</bundles_post_ra>
